<compile_context>
chip_gen: v7x
topology: tpu7x:2x2x1
jax: 0.10.0
libtpu: 0.0.40
codegen_flags: <defaults>
</compile_context>

<pallas_src>
import jax
import jax.numpy as jnp
from jax.experimental import pallas as pl
from jax.experimental.pallas import tpu as pltpu


# ----------------------------------------------------------------------------
# Packed weight slab layout (rows x 128 lanes, f32):
#   W1  (30, 2)   -> rows  0:30, cols  0:2
#   b1  (30, 1)   -> rows  0:30, cols  4:5
#   W2  (20, 30)  -> rows 32:52, cols  0:30
#   b2  (20, 1)   -> rows 32:52, cols 32:33
#   W3  (10, 20)  -> rows 56:66, cols  0:20
#   b3  (10, 1)   -> rows 56:66, cols 24:25
#   W4T (10, 1)   -> rows 56:66, cols 28:29
#   b4  (1, 1)    -> rows 56:57, cols 32:33
# ----------------------------------------------------------------------------
_SLAB_SHAPE = (72, 128)


def _controller_kernel(x_ref, slab_ref, o_ref):
    """One lane-dense batch tile: x (2, tile_b) -> out (1, tile_b)."""
    x = x_ref[...]                       # (2, tile_b) f32
    slab = slab_ref[...]                 # (72, 128)   f32

    w1 = slab[0:30, 0:2]                 # (30, 2)
    b1 = slab[0:30, 4:5]                 # (30, 1)
    w2 = slab[32:52, 0:30]               # (20, 30)
    b2 = slab[32:52, 32:33]              # (20, 1)
    w3 = slab[56:66, 0:20]               # (10, 20)
    b3 = slab[56:66, 24:25]              # (10, 1)
    w4t = slab[56:66, 28:29]             # (10, 1)  == W4.T
    b4 = slab[56:57, 32:33]              # (1, 1)

    # Layer 1 (K=2): VPU broadcast-multiply-add; no MXU fill/drain.
    h1 = w1[:, 0:1] * x[0:1, :] + w1[:, 1:2] * x[1:2, :] + b1
    h1 = jnp.maximum(h1, 0.0)            # (30, tile_b)

    # Layers 2 & 3: MXU matmuls.
    h2 = jnp.dot(w2, h1, preferred_element_type=jnp.float32) + b2
    h2 = jnp.maximum(h2, 0.0)            # (20, tile_b)
    h3 = jnp.dot(w3, h2, preferred_element_type=jnp.float32) + b3
    h3 = jnp.maximum(h3, 0.0)            # (10, tile_b)

    # Layer 4 (N=1): VPU multiply + sublane reduce, lane-dense output row.
    y = jnp.sum(w4t * h3, axis=0, keepdims=True) + b4   # (1, tile_b)

    o_ref[...] = y.astype(o_ref.dtype)


def pack_params(params):
    """Pack all weights/biases into one (72, 128) f32 slab."""
    slab = jnp.zeros(_SLAB_SHAPE, jnp.float32)
    slab = slab.at[0:30, 0:2].set(params["w1"])
    slab = slab.at[0:30, 4:5].set(params["b1"][:, None])
    slab = slab.at[32:52, 0:30].set(params["w2"])
    slab = slab.at[32:52, 32:33].set(params["b2"][:, None])
    slab = slab.at[56:66, 0:20].set(params["w3"])
    slab = slab.at[56:66, 24:25].set(params["b3"][:, None])
    slab = slab.at[56:66, 28:29].set(params["w4"].T)        # (1,10) -> (10,1)
    slab = slab.at[56:57, 32:33].set(params["b4"][:, None])
    return slab


def controller_forward(x, params, *, tile_b=1024):
    """x: [B, 2] float32.  params: PyTorch-layout (out,in) weights + (out,) biases."""
    B, fin = x.shape
    assert fin == 2

    slab = pack_params(params)

    # Lane-dense tiling: batch on the 128-lane axis, tiles a multiple of 128.
    b_lanes = ((B + 127) // 128) * 128
    tile_b = max(128, (min(tile_b, b_lanes) // 128) * 128)
    n_tiles = pl.cdiv(b_lanes, tile_b)
    b_pad = n_tiles * tile_b

    x_t = jnp.zeros((2, b_pad), jnp.float32).at[:, :B].set(
        x.T.astype(jnp.float32))

    flops = 2 * b_pad * (2 * 30 + 30 * 20 + 20 * 10 + 10 * 1)
    bytes_accessed = x_t.size * 4 + b_pad * 4 + slab.size * 4

    out_t = pl.pallas_call(
        _controller_kernel,
        out_shape=jax.ShapeDtypeStruct((1, b_pad), jnp.float32),
        grid_spec=pl.GridSpec(
            grid=(n_tiles,),
            in_specs=[
                pl.BlockSpec((2, tile_b), lambda i: (0, i)),      # x tile
                pl.BlockSpec(_SLAB_SHAPE, lambda i: (0, 0)),      # packed weights
            ],
            out_specs=pl.BlockSpec((1, tile_b), lambda i: (0, i)),
        ),
        compiler_params=pltpu.CompilerParams(
            dimension_semantics=("parallel",)),
        cost_estimate=pl.CostEstimate(
            flops=flops, transcendentals=0, bytes_accessed=bytes_accessed),
    )(x_t, slab)

    return out_t[0, :B][:, None]                                  # (B, 1)


def init_params(key):
    """Deterministic synthetic params in PyTorch Linear layout: W (out,in), b (out,)."""
    dims = [(30, 2), (20, 30), (10, 20), (1, 10)]
    params = {}
    for idx, (out_f, in_f) in enumerate(dims, start=1):
        key, kw, kb = jax.random.split(key, 3)
        bound = 1.0 / jnp.sqrt(in_f)
        params[f"w{idx}"] = jax.random.uniform(
            kw, (out_f, in_f), jnp.float32, -bound, bound)
        params[f"b{idx}"] = jax.random.uniform(
            kb, (out_f,), jnp.float32, -bound, bound)
    return params


def reference_forward(x, params):
    hp = jax.lax.Precision.HIGHEST
    h = jnp.maximum(jnp.dot(x, params["w1"].T, precision=hp) + params["b1"], 0.0)
    h = jnp.maximum(jnp.dot(h, params["w2"].T, precision=hp) + params["b2"], 0.0)
    h = jnp.maximum(jnp.dot(h, params["w3"].T, precision=hp) + params["b3"], 0.0)
    return jnp.dot(h, params["w4"].T, precision=hp) + params["b4"]


if __name__ == "__main__":
    key = jax.random.PRNGKey(0)
    key, kx = jax.random.split(key)

    B = 200  # small batch; not a multiple of 128 to exercise lane padding
    x = jax.random.normal(kx, (B, 2), jnp.float32)

    params = init_params(key)

    out = controller_forward(x, params)
    out = jax.block_until_ready(out)

    ref = reference_forward(x, params)
    assert out.shape == (B, 1)
    assert jnp.allclose(out, ref, atol=1e-4, rtol=1e-4), (
        float(jnp.max(jnp.abs(out - ref))))

    print("KERNEL_OK")
</pallas_src>

<mosaic_0001>
module attributes {stable_mosaic.version = 11 : i64} {
  func.func @_controller_kernel(%arg0: i32, %arg1: memref<2x256xf32, #tpu.memory_space<vmem>>, %arg2: memref<72x128xf32, #tpu.memory_space<vmem>>, %arg3: memref<1x256xf32, #tpu.memory_space<vmem>>) attributes {dimension_semantics = [#tpu.dimension_semantics<parallel>], iteration_bounds = array<i64: 1>, scalar_prefetch = 0 : i64, scratch_operands = 0 : i64, tpu.core_type = #tpu.core_type<tc>, window_params = [{transform_indices = @transform_0, window_bounds = array<i64: 2, 256>}, {pipeline_mode = #tpu.pipeline_mode<synchronous>, transform_indices = @transform_1, window_bounds = array<i64: 72, 128>}, {transform_indices = @transform_2, window_bounds = array<i64: 1, 256>}]} {
    %c0 = arith.constant 0 : index
    %c0_0 = arith.constant 0 : index
    %0 = vector.load %arg1[%c0, %c0_0] : memref<2x256xf32, #tpu.memory_space<vmem>>, vector<2x256xf32>
    %c0_1 = arith.constant 0 : index
    %c0_2 = arith.constant 0 : index
    %1 = vector.load %arg2[%c0_1, %c0_2] : memref<72x128xf32, #tpu.memory_space<vmem>>, vector<72x128xf32>
    %2 = vector.extract_strided_slice %1 {offsets = [0, 0], sizes = [30, 2], strides = [1, 1]} : vector<72x128xf32> to vector<30x2xf32>
    %3 = vector.extract_strided_slice %1 {offsets = [0, 4], sizes = [30, 1], strides = [1, 1]} : vector<72x128xf32> to vector<30x1xf32>
    %4 = vector.extract_strided_slice %1 {offsets = [32, 0], sizes = [20, 30], strides = [1, 1]} : vector<72x128xf32> to vector<20x30xf32>
    %5 = vector.extract_strided_slice %1 {offsets = [32, 32], sizes = [20, 1], strides = [1, 1]} : vector<72x128xf32> to vector<20x1xf32>
    %6 = vector.extract_strided_slice %1 {offsets = [56, 0], sizes = [10, 20], strides = [1, 1]} : vector<72x128xf32> to vector<10x20xf32>
    %7 = vector.extract_strided_slice %1 {offsets = [56, 24], sizes = [10, 1], strides = [1, 1]} : vector<72x128xf32> to vector<10x1xf32>
    %8 = vector.extract_strided_slice %1 {offsets = [56, 28], sizes = [10, 1], strides = [1, 1]} : vector<72x128xf32> to vector<10x1xf32>
    %9 = vector.extract_strided_slice %1 {offsets = [56, 32], sizes = [1, 1], strides = [1, 1]} : vector<72x128xf32> to vector<1x1xf32>
    %10 = vector.extract_strided_slice %2 {offsets = [0, 0], sizes = [30, 1], strides = [1, 1]} : vector<30x2xf32> to vector<30x1xf32>
    %11 = vector.extract_strided_slice %0 {offsets = [0, 0], sizes = [1, 256], strides = [1, 1]} : vector<2x256xf32> to vector<1x256xf32>
    %12 = vector.broadcast %10 : vector<30x1xf32> to vector<30x256xf32>
    %13 = vector.broadcast %11 : vector<1x256xf32> to vector<30x256xf32>
    %14 = arith.mulf %12, %13 : vector<30x256xf32>
    %15 = vector.extract_strided_slice %2 {offsets = [0, 1], sizes = [30, 1], strides = [1, 1]} : vector<30x2xf32> to vector<30x1xf32>
    %16 = vector.extract_strided_slice %0 {offsets = [1, 0], sizes = [1, 256], strides = [1, 1]} : vector<2x256xf32> to vector<1x256xf32>
    %17 = vector.broadcast %15 : vector<30x1xf32> to vector<30x256xf32>
    %18 = vector.broadcast %16 : vector<1x256xf32> to vector<30x256xf32>
    %19 = arith.mulf %17, %18 : vector<30x256xf32>
    %20 = arith.addf %14, %19 : vector<30x256xf32>
    %21 = vector.broadcast %3 : vector<30x1xf32> to vector<30x256xf32>
    %22 = arith.addf %20, %21 : vector<30x256xf32>
    %cst = arith.constant 0.000000e+00 : f32
    %23 = vector.broadcast %cst : f32 to vector<30x256xf32>
    %24 = arith.maximumf %22, %23 : vector<30x256xf32>
    %cst_3 = arith.constant dense<0.000000e+00> : vector<20x256xf32>
    %25 = tpu.matmul %4, %24, %cst_3 {dimension_numbers = #tpu.dot_dimension_numbers<[1], [0], [0], [1], [0, 0, 1, 1], [], []>} : vector<20x30xf32>, vector<30x256xf32>, vector<20x256xf32> -> vector<20x256xf32>
    %26 = vector.broadcast %5 : vector<20x1xf32> to vector<20x256xf32>
    %27 = arith.addf %25, %26 : vector<20x256xf32>
    %cst_4 = arith.constant 0.000000e+00 : f32
    %28 = vector.broadcast %cst_4 : f32 to vector<20x256xf32>
    %29 = arith.maximumf %27, %28 : vector<20x256xf32>
    %cst_5 = arith.constant dense<0.000000e+00> : vector<10x256xf32>
    %30 = tpu.matmul %6, %29, %cst_5 {dimension_numbers = #tpu.dot_dimension_numbers<[1], [0], [0], [1], [0, 0, 1, 1], [], []>} : vector<10x20xf32>, vector<20x256xf32>, vector<10x256xf32> -> vector<10x256xf32>
    %31 = vector.broadcast %7 : vector<10x1xf32> to vector<10x256xf32>
    %32 = arith.addf %30, %31 : vector<10x256xf32>
    %cst_6 = arith.constant 0.000000e+00 : f32
    %33 = vector.broadcast %cst_6 : f32 to vector<10x256xf32>
    %34 = arith.maximumf %32, %33 : vector<10x256xf32>
    %35 = vector.broadcast %8 : vector<10x1xf32> to vector<10x256xf32>
    %36 = arith.mulf %35, %34 : vector<10x256xf32>
    %cst_7 = arith.constant dense<0.000000e+00> : vector<256xf32>
    %37 = vector.multi_reduction <add>, %36, %cst_7 [0] : vector<10x256xf32> to vector<256xf32>
    %38 = vector.shape_cast %37 : vector<256xf32> to vector<1x256xf32>
    %39 = vector.broadcast %9 : vector<1x1xf32> to vector<1x256xf32>
    %40 = arith.addf %38, %39 : vector<1x256xf32>
    %c0_8 = arith.constant 0 : index
    %c0_9 = arith.constant 0 : index
    %41 = vector.load %arg3[%c0_8, %c0_9] : memref<1x256xf32, #tpu.memory_space<vmem>>, vector<1x256xf32>
    tpu.vector_store %arg3[%c0_8, %c0_9], %40 {strides = array<i32>} : memref<1x256xf32, #tpu.memory_space<vmem>>, vector<1x256xf32>,
    return
  }
  func.func @transform_0(%arg0: i32) -> (i32, i32) {
    %c0_i32 = arith.constant 0 : i32
    %c0_i32_0 = arith.constant 0 : i32
    return %c0_i32, %arg0 : i32, i32
  }
  func.func @transform_1(%arg0: i32) -> (i32, i32) {
    %c0_i32 = arith.constant 0 : i32
    %c0_i32_0 = arith.constant 0 : i32
    %c0_i32_1 = arith.constant 0 : i32
    return %c0_i32, %c0_i32_0 : i32, i32
  }
  func.func @transform_2(%arg0: i32) -> (i32, i32) {
    %c0_i32 = arith.constant 0 : i32
    %c0_i32_0 = arith.constant 0 : i32
    return %c0_i32, %arg0 : i32, i32
  }
}

</mosaic_0001>

<bundles_post_ra>
// kernel: tpu_custom_call.1
= control target key start
LH: loop header
LB: loop body
LE: loop exit
PB: predicated region body
PF: predicated region fallthrough
CT: control target
= control target key end

     0   :  { %7 = vsyncpa [#allocation3], 0  ;;  %s698_s0 = inlined_call_operand.hbm [shape: f32[2,256], index: 0, kind: input, shape index: {}]   ;;  %s699_s1 = inlined_call_operand.hbm [shape: f32[72,128], index: 1, kind: input, shape index: {}]   ;;  %s700_s2 = inlined_call_operand.hbm [shape: f32[1,256], index: 2, kind: output, shape index: {}]  }
   0x1   :  { %8 = vsyncpa [#allocation6], 0 }
   0x2   :  { %9 = vsyncpa [#allocation4], 0  ;;  %s596_s9 = smov [#allocation2]   ;;  %s597_s11 = smov [#allocation5]  }
   0x3   :  { %s16_s10 = sshll.u32 %s596_s9, 4  ;;  %s25_s12 = sshll.u32 %s597_s11, 4  ;;  %s17_s10 = int_to_ptr.vmem [resolvable:$true] %s16_s10  ;;  %s625_s12 = int_to_ptr.vmem [resolvable:$true] %s25_s12 }
   0x4   :  { %s524_s15 = scalar_lea.hbm %s698_s0, 64 }
   0x5   :  { %p525_p0 = scmp.ne.s32.totalorder %s698_s0, %s524_s15  ;;  %p528_p1 = scmp.lt.u32.totalorder %s524_s15, %s698_s0 }
   0x7   :  { %p530_p2 = pnand %p528_p1, %p525_p0 }
   0x9   :  { %533 = shalt.err (!%p530_p2)
}
   0xa   :  { %s534_s20 = scalar_lea.vmem %s17_s10, 64  ;;  %p539_p4 = scmp.lt.s32.totalorder %s17_s10, %s17_s10 }
   0xb   :  { %p535_p3 = scmp.ne.s32.totalorder %s17_s10, %s534_s20  ;;  %p540_p5 = scmp.lt.s32.totalorder %s534_s20, %s534_s20 }
   0xd   :  { %p541_p6 = por %p540_p5, %p539_p4 }
   0xf   :  { %p542_p7 = pnand %p541_p6, %p535_p3 }
  0x11   :  { %545 = shalt.err (!%p542_p7)
}
  0x12   :  { %19 = dma.hbm_to_vmem [thread:$0]  %s698_s0, 64, %s17_s10, [#allocation3]  }
  0x13   :  { %s546_s25 = scalar_lea.hbm %s699_s1, 1152 }
  0x14   :  { %p547_p8 = scmp.ne.s32.totalorder %s699_s1, %s546_s25  ;;  %p550_p9 = scmp.lt.u32.totalorder %s546_s25, %s699_s1 }
  0x16   :  { %p552_p10 = pnand %p550_p9, %p547_p8 }
  0x18   :  { %555 = shalt.err (!%p552_p10)
}
  0x19   :  { %s556_s30 = scalar_lea.vmem %s625_s12, 1152  ;;  %p561_p12 = scmp.lt.s32.totalorder %s625_s12, %s625_s12 }
  0x1a   :  { %p557_p11 = scmp.ne.s32.totalorder %s625_s12, %s556_s30  ;;  %p562_p13 = scmp.lt.s32.totalorder %s556_s30, %s556_s30 }
  0x1c   :  { %p563_p0 = por %p562_p13, %p561_p12 }
  0x1e   :  { %p564_p1 = pnand %p563_p0, %p557_p11 }
  0x20   :  { %567 = shalt.err (!%p564_p1)
}
  0x21   :  { %s598_s0 = smov 128   ;;  %s599_s3 = smov 8  }
  0x22   :  { %31 = dma.hbm_to_vmem [thread:$0]  %s699_s1, 1152, %s625_s12, [#allocation6], %s598_s0, %s598_s0, %s599_s3  }
  0x23   :  { %590 = dma.done.wait [#allocation3], 64  }
  0x24   :  { %591 = vsyncadd [#allocation3], 4294967232 }
  0x25   :  { %592 = dma.done.wait [#allocation6], 1152  }
  0x26   :  { %593 = vsyncadd [#allocation6], 4294966144  ;;  %v600_v0 = vmov 1   ;;  %v601_v1 = vmov 0   ;;  %v39_v2 = vld [vmem:[#allocation5] sm:$0xff]  ;;  %v40_v3 = vld [vmem:[#allocation5 + $0x8] sm:$0xff]  ;;  %v69_v12 = vlaneseq }
  0x27   :  { %510 = vset.pattern.permute.xlu1 %v600_v0  ;;  %509 = vset.pattern.permute.xlu0 %v601_v1  ;;  %v41_v4 = vld [vmem:[#allocation5 + $0x10] sm:$0xff]  ;;  %v42_v5 = vld [vmem:[#allocation5 + $0x18] sm:$0xff]  ;;  %v602_v6 = vmov 4   ;;  %v603_v7 = vmov 0.0   ;;  %v658_v8 = vld [vmem:[#allocation5 + $0x20] sm:$0xff]  ;;  %v604_v10 = vmov 32  }
  0x28   :  { %96 = vperm.xlu1 %510, %v39_v2   ;;  %50 = vperm.xlu0 %509, %v39_v2   ;;  %v660_v9 = vld [vmem:[#allocation5 + $0x28] sm:$0xff]  ;;  %v666_v11 = vld [vmem:[#allocation5 + $0x30] sm:$0xff]  ;;  %v670_v13 = vshrl.u32 %v69_v12, 7  ;;  %v38_v20 = vld [vmem:[#allocation2] sm:$0xf]  ;;  %vm199_vm0 = vcmask 1045504  }
  0x29   :  { %270 = vmatprep.mubr.f32.mxu0 %v603_v7  ;;  %381 = vmatprep.mubr.f32.mxu1 %v603_v7  ;;  %vm605_vm1 = vmmov 1   ;;  %vm192_vm3 = vcmask 244736   ;;  %vm310_vm4 = vcmask 1043456   ;;  %vm305_vm5 = vcmask 162816   ;;  %s609_s1 = smov [#allocation7]  }
  0x2a   :  { %v113_v16 = vsub.s32 1, %v670_v13  ;;  %v117_v17 = vsub.s32 3, %v670_v13  ;;  %v71_v18 = vsub.s32 0, %v670_v13  ;;  %v75_v19 = vsub.s32 2, %v670_v13  ;;  %vm486_vm2 = vmpackc.low %vm199_vm0, %vm605_vm1  ;;  %s462_s6 = sshll.u32 %s609_s1, 4  ;;  %s463_s6 = int_to_ptr.vmem [resolvable:$true] %s462_s6 }
  0x2b   :  { %vm410_vm6 = vcmask 1041408   ;;  %vm453_vm7 = vcmp.lt.s32.totalorder %v69_v12, 256  ;;  %s568_s7 = scalar_lea.vmem %s463_s6, 32  ;;  %p573_p3 = scmp.lt.s32.totalorder %s463_s6, %s463_s6 }
  0x2c   :  { %100 = vperm.xlu1 %510, %v40_v3   ;;  %55 = vperm.xlu0 %509, %v40_v3   ;;  %v114_v23 = vrot.slane %v38_v20, %v113_v16  ;;  %v118_v24 = vrot.slane %v38_v20, %v117_v17  ;;  %v72_v25 = vrot.slane %v38_v20, %v71_v18  ;;  %p569_p2 = scmp.ne.s32.totalorder %s463_s6, %s568_s7  ;;  %p574_p4 = scmp.lt.s32.totalorder %s568_s7, %s568_s7 }
  0x2d   :  { %v76_v26 = vrot.slane %v38_v20, %v75_v19 }
  0x2e   :  { %v124_v29 = vrot.slane %v114_v23, %v113_v16  ;;  %v128_v30 = vrot.slane %v118_v24, %v113_v16  ;;  %v82_v31 = vrot.slane %v72_v25, %v71_v18  ;;  %p575_p5 = por %p574_p4, %p573_p3 }
  0x2f   :  { %v86_v32 = vrot.slane %v76_v26, %v71_v18  ;;  %v46_v26 = vld [vmem:[#allocation5 + $0x38] sm:$0xff] }
  0x30   :  { %511 = vset.pattern.permute.xlu1 %v601_v1  ;;  %60 = vperm.xlu0 %509, %v41_v4   ;;  %p576_p6 = pnand %p575_p5, %p569_p2 }
  0x31   :  { %65 = vperm.xlu1 %511, %v42_v5  }
  0x34   :  { %512 = vset.pattern.permute.xlu0 %v600_v0 }
  0x35   :  { %513 = vset.pattern.permute.xlu1 %v600_v0  ;;  %104 = vperm.xlu0 %512, %v41_v4  }
  0x36   :  { %108 = vperm.xlu1 %513, %v42_v5  }
  0x39   :  { %515 = vset.pattern.permute.xlu0 %v602_v6 }
  0x3a   :  { %514 = vset.pattern.permute.xlu1 %v602_v6  ;;  %150 = vperm.xlu0 %515, %v40_v3  }
  0x3b   :  { %146 = vperm.xlu1 %514, %v39_v2  }
  0x3e   :  { %516 = vset.pattern.permute.xlu0 %v604_v10 }
  0x3f   :  { %154 = vperm.xlu1 %514, %v41_v4   ;;  %179 = vperm.xlu0 %516, %v658_v8  }
  0x43   :  { %158 = vperm.xlu1 %514, %v42_v5  }
  0x47   :  { %517 = vset.pattern.permute.xlu1 %v604_v10 }
  0x48   :  { %184 = vperm.xlu1 %517, %v660_v9  }
  0x4c   :  { %189 = vperm.xlu1 %517, %v666_v11  }
  0xa7   :  { %v97_v14 = vpop.permute.xlu1 %96  ;;  %v51_v15 = vpop.permute.xlu0 %50 }
  0xa8   :  { %v129_v38 = vmul.f32 %v124_v29, %v97_v14  ;;  %v130_v39 = vmul.f32 %v128_v30, %v97_v14  ;;  %v87_v40 = vmul.f32 %v82_v31, %v51_v15  ;;  %v88_v41 = vmul.f32 %v86_v32, %v51_v15 }
  0xaa   :  { %v137_v46 = vadd.f32 %v129_v38, %v87_v40  ;;  %v138_v47 = vadd.f32 %v130_v39, %v88_v41 }
  0xab   :  { %v101_v21 = vpop.permute.xlu1 %100  ;;  %v56_v22 = vpop.permute.xlu0 %55 }
  0xac   :  { %v131_v33 = vmul.f32 %v124_v29, %v101_v21  ;;  %v132_v34 = vmul.f32 %v128_v30, %v101_v21  ;;  %v89_v35 = vmul.f32 %v82_v31, %v56_v22  ;;  %v90_v36 = vmul.f32 %v86_v32, %v56_v22 }
  0xae   :  { %v139_v43 = vadd.f32 %v131_v33, %v89_v35  ;;  %v140_v44 = vadd.f32 %v132_v34, %v90_v36 }
  0xaf   :  { %v61_v27 = vpop.permute.xlu0 %60 }
  0xb0   :  { %v66_v28 = vpop.permute.xlu1 %65  ;;  %v91_v55 = vmul.f32 %v82_v31, %v61_v27  ;;  %v92_v56 = vmul.f32 %v86_v32, %v61_v27  ;;  %v47_v27 = vld [vmem:[#allocation5 + $0x40] sm:$0xff] }
  0xb1   :  { %v93_v63 = vmul.f32 %v82_v31, %v66_v28  ;;  %v94_v0 = vmul.f32 %v86_v32, %v66_v28  ;;  %v606_v28 = vmov 24  }
  0xb2   :  { %518 = vset.pattern.permute.xlu0 %v606_v28  ;;  %519 = vset.pattern.permute.xlu1 %v606_v28 }
  0xb3   :  { %302 = vperm.xlu0 %518, %v47_v27   ;;  %297 = vperm.xlu1 %519, %v46_v26  }
  0xb4   :  { %v105_v37 = vpop.permute.xlu0 %104 }
  0xb5   :  { %v109_v42 = vpop.permute.xlu1 %108  ;;  %v133_v51 = vmul.f32 %v124_v29, %v105_v37  ;;  %v134_v52 = vmul.f32 %v128_v30, %v105_v37 }
  0xb6   :  { %v135_v59 = vmul.f32 %v124_v29, %v109_v42  ;;  %v136_v60 = vmul.f32 %v128_v30, %v109_v42  ;;  %v607_v29 = vmov 28  }
  0xb7   :  { %v141_v2 = vadd.f32 %v133_v51, %v91_v55  ;;  %v142_v3 = vadd.f32 %v134_v52, %v92_v56  ;;  %521 = vset.pattern.permute.xlu0 %v607_v29  ;;  %520 = vset.pattern.permute.xlu1 %v607_v29 }
  0xb8   :  { %v143_v15 = vadd.f32 %v135_v59, %v93_v63  ;;  %v144_v16 = vadd.f32 %v136_v60, %v94_v0  ;;  %399 = vperm.xlu0 %521, %v46_v26   ;;  %403 = vperm.xlu1 %520, %v47_v27  }
  0xb9   :  { %v151_v45 = vpop.permute.xlu0 %150 }
  0xba   :  { %v163_v48 = vadd.f32 %v151_v45, %v139_v43  ;;  %v164_v49 = vadd.f32 %v151_v45, %v140_v44  ;;  %v147_v50 = vpop.permute.xlu1 %146 }
  0xbb   :  { %v161_v53 = vadd.f32 %v147_v50, %v137_v46  ;;  %v162_v54 = vadd.f32 %v147_v50, %v138_v47 }
  0xbc   :  { %v171_v57 = vmax.f32 %v163_v48, 0.0  ;;  %v172_v58 = vmax.f32 %v164_v49, 0.0  ;;  %522 = vset.pattern.permute.xlu1 %v604_v10  ;;  %523 = vset.pattern.permute.xlu0 %v604_v10 }
  0xbd   :  { %v169_v61 = vmax.f32 %v161_v53, 0.0  ;;  %v170_v62 = vmax.f32 %v162_v54, 0.0  ;;  %428 = vperm.xlu1 %522, %v46_v26  }
  0xbe   :  { %v155_v1 = vpop.permute.xlu1 %154 }
  0xbf   :  { %v481_v4 = vpack.c.bf16 %v172_v58, %v170_v62  ;;  %v483_v5 = vpack.c.bf16 %v171_v57, %v169_v61  ;;  %v165_v6 = vadd.f32 %v155_v1, %v141_v2  ;;  %v166_v14 = vadd.f32 %v155_v1, %v142_v3 }
  0xc1   :  { %482 = vmatprep.subr.bf16.mxu0 %v481_v4  ;;  %v173_v20 = vmax.f32 %v165_v6, 0.0  ;;  %v174_v21 = vmax.f32 %v166_v14, 0.0 }
  0xc2   :  { %v159_v17 = vpop.permute.xlu1 %158  ;;  %484 = vmatpush1.bf16.msra.mxu0 %v483_v5 }
  0xc3   :  { %v167_v18 = vadd.f32 %v159_v17, %v143_v15  ;;  %v168_v19 = vadd.f32 %v159_v17, %v144_v16 }
  0xc5   :  { %v175_v22 = vmax.f32 %v167_v18, 0.0  ;;  %v176_v23 = vmax.f32 %v168_v19, 0.0 }
  0xc7   :  { %v485_v24 = vpack.c.bf16 %v176_v23, %v174_v21  ;;  %v488_v25 = vpack.c.bf16 %v175_v22, %v173_v20  ;;  %v185_v31 = vpop.permute.xlu1 %184  ;;  %v608_v20 = vmov 1966171168  }
  0xc8   :  { %v437_v21 = vunpack.c.l.s4 %v608_v20 }
  0xc9   :  { %487 = vmatprep.subr.msk.bf16.mxu0 %vm486_vm2, %v485_v24 }
  0xca   :  { %490 = vmatpush1.bf16.msk.msra.mxu0 %vm486_vm2, %v488_v25 }
  0xcb   :  { %v190_v42 = vpop.permute.xlu1 %189 }
  0xcd   :  { %474 = vmatmul.mubr.msk.f32.vlgmr.msra.gmra.mrb[0].mxu0 %vm192_vm3, %v658_v8  ;;  %v180_v8 = vpop.permute.xlu0 %179 }
  0xce   :  { %276 = vmatprep.mubr.f32.mxu0 %v603_v7 }
  0xd1   :  { %475 = vmatmul.mubr.msk.f32.gmra.mrb[2].mxu0 %vm192_vm3, %v660_v9 }
  0xd2   :  { %282 = vmatprep.mubr.f32.mxu0 %v603_v7 }
  0xd5   :  { %476 = vmatmul.mubr.msk.f32.gmra.mrb[4].mxu0 %vm192_vm3, %v666_v11 }
 0x132   :  { %v298_v49 = vpop.permute.xlu1 %297  ;;  %v303_v51 = vpop.permute.xlu0 %302 }
 0x137   :  { %v404_v60 = vpop.permute.xlu1 %403  ;;  %v400_v62 = vpop.permute.xlu0 %399 }
 0x1a0   :  { %v272_v9 = vpop.f32.mrb[0].mxu0 }
 0x1a1   :  { %v274_v11 = vpop.f32.mrb[1].mxu0  ;;  %v273_v30 = vadd.f32 %v272_v9, %v180_v8 }
 0x1a2   :  { %v275_v32 = vadd.f32 %v274_v11, %v180_v8 }
 0x1a3   :  { %v289_v37 = vmax.f32 %v273_v30, 0.0 }
 0x1a4   :  { %v278_v33 = vpop.f32.mrb[2].mxu0  ;;  %v290_v39 = vmax.f32 %v275_v32, 0.0 }
 0x1a5   :  { %v279_v34 = vadd.f32 %v278_v33, %v185_v31  ;;  %v280_v35 = vpop.f32.mrb[3].mxu0 }
 0x1a6   :  { %v281_v36 = vadd.f32 %v280_v35, %v185_v31 }
 0x1a7   :  { %v291_v38 = vmax.f32 %v279_v34, 0.0 }
 0x1a8   :  { %v292_v40 = vmax.f32 %v281_v36, 0.0  ;;  %v284_v41 = vpop.f32.mrb[4].mxu0 }
 0x1a9   :  { %v286_v43 = vpop.f32.mrb[5].mxu0  ;;  %v493_v44 = vpack.c.bf16 %v291_v38, %v289_v37  ;;  %v285_v46 = vadd.f32 %v284_v41, %v190_v42 }
 0x1aa   :  { %v287_v10 = vadd.f32 %v286_v43, %v190_v42  ;;  %v491_v45 = vpack.c.bf16 %v292_v40, %v290_v39 }
 0x1ab   :  { %v293_v48 = vmax.f32 %v285_v46, 0.0 }
 0x1ac   :  { %v294_v47 = vmax.f32 %v287_v10, 0.0  ;;  %492 = vmatprep.subr.bf16.mxu1 %v491_v45 }
 0x1ad   :  { %494 = vmatpush1.bf16.msra.mxu1 %v493_v44 }
 0x1ae   :  { %477 = vmatprep.subr.msk.mxu1 %vm310_vm4, %v294_v47 }
 0x1b1   :  { %478 = vmatpush1.msk.msra.mxu1 %vm310_vm4, %v293_v48 }
 0x1b2   :  { %479 = vmatmul.mubr.msk.f32.vlgmr.msra.gmra.mrb[0].mxu1 %vm305_vm5, %v46_v26  ;;  %v438_v26 = vunpack.c.0.s8 %v437_v21 }
 0x1b3   :  { %387 = vmatprep.mubr.f32.mxu1 %v603_v7 }
 0x1b4   :  { %v441_v11 = vsub.s32 %v438_v26, %v670_v13 }
 0x1b6   :  { %480 = vmatmul.mubr.msk.f32.gmra.mrb[2].mxu1 %vm305_vm5, %v47_v27  ;;  %v429_v27 = vpop.permute.xlu1 %428 }
 0x285   :  { %v383_v50 = vpop.f32.mrb[0].mxu1 }
 0x286   :  { %v385_v52 = vpop.f32.mrb[1].mxu1  ;;  %v384_v53 = vadd.f32 %v383_v50, %v298_v49 }
 0x287   :  { %v386_v54 = vadd.f32 %v385_v52, %v298_v49 }
 0x288   :  { %v394_v58 = vmax.f32 %v384_v53, 0.0 }
 0x289   :  { %v389_v55 = vpop.f32.mrb[2].mxu1  ;;  %v395_v61 = vmax.f32 %v386_v54, 0.0 }
 0x28a   :  { %v390_v56 = vadd.f32 %v389_v55, %v303_v51  ;;  %v391_v57 = vpop.f32.mrb[3].mxu1  ;;  %v406_v7 = vmul.f32 %v400_v62, %v394_v58 }
 0x28b   :  { %v392_v59 = vadd.f32 %v391_v57, %v303_v51  ;;  %v407_v3 = vmul.f32 %v400_v62, %v395_v61 }
 0x28c   :  { %v396_v63 = vmax.f32 %v390_v56, 0.0 }
 0x28d   :  { %v397_v0 = vmax.f32 %v392_v59, 0.0 }
 0x28e   :  { %v408_v1 = vmul.f32 %v404_v60, %v396_v63 }
 0x28f   :  { %v409_v2 = vmul.f32 %v404_v60, %v397_v0 }
 0x290   :  { %v411_v4 = vsel %vm410_vm6, %v408_v1, 0.0 }
 0x291   :  { %v412_v5 = vadd.f32 %v411_v4, %v406_v7  ;;  %v419_v6 = vsel %vm410_vm6, %v409_v2, 0.0 }
 0x292   :  { %v420_v14 = vadd.f32 %v419_v6, %v407_v3 }
 0x293   :  { %v413_v15 = vrot.slane %v412_v5, 4 }
 0x294   :  { %v421_v16 = vrot.slane %v420_v14, 4 }
 0x295   :  { %v414_v17 = vadd.f32 %v413_v15, %v412_v5 }
 0x296   :  { %v422_v18 = vadd.f32 %v421_v16, %v420_v14 }
 0x297   :  { %v415_v19 = vrot.slane %v414_v17, 2 }
 0x298   :  { %v423_v22 = vrot.slane %v422_v18, 2 }
 0x299   :  { %v416_v23 = vadd.f32 %v415_v19, %v414_v17 }
 0x29a   :  { %v424_v24 = vadd.f32 %v423_v22, %v422_v18 }
 0x29b   :  { %v417_v25 = vrot.slane %v416_v23, 1 }
 0x29c   :  { %v425_v28 = vrot.slane %v424_v24, 1 }
 0x29d   :  { %v418_v29 = vadd.f32 %v417_v25, %v416_v23 }
 0x29e   :  { %v426_v8 = vadd.f32 %v425_v28, %v424_v24 }
 0x29f   :  { %v431_v9 = vadd.f32 %v429_v27, %v418_v29 }
 0x2a0   :  { %v432_v30 = vadd.f32 %v429_v27, %v426_v8 }
 0x2a2   :  { %v435_v31 = vcombine.low %v431_v9, %v432_v30 }
 0x2a4   :  { %v442_v32 = vrot.slane %v435_v31, %v441_v11 }
 0x2a6   :  { %v449_v33 = vrot.slane %v442_v32, %v441_v11 }
 0x2a8   :  { %455 = vst.msk [vmem:[#allocation7] sm:$0x3] %vm453_vm7, %v449_v33 }
 0x2a9   :  { %579 = shalt.err (!%p576_p6)
}
 0x2aa   :  { %s580_s10 = scalar_lea.hbm %s700_s2, 32 }
 0x2ab   :  { %p581_p7 = scmp.ne.s32.totalorder %s700_s2, %s580_s10  ;;  %p584_p8 = scmp.lt.u32.totalorder %s580_s10, %s700_s2 }
 0x2ad   :  { %p586_p9 = pnand %p584_p8, %p581_p7 }
 0x2af   :  { %589 = shalt.err (!%p586_p9)
}
 0x2b0   :  { %465 = dma.vmem_to_hbm [thread:$0]  %s463_s6, 32, %s700_s2, [#allocation4]  }
 0x2b1   :  { %594 = dma.done.wait [#allocation4], 32  }
 0x2b2   :  { %595 = vsyncadd [#allocation4], 4294967264 }
 0x2b3   :  { %469 = vsyncpa [#allocation3], 1 }
 0x2b4   :  { %470 = vsyncpa [#allocation6], 1 }
 0x2b5   :  { %471 = vsyncpa [#allocation4], 1 }

</bundles_post_ra>
